<compile_context>
chip_gen: v5e
topology: v5e:2x2
jax: 0.10.0
libtpu: 0.0.40
codegen_flags: <defaults>
</compile_context>

<pallas_src>
import functools

import jax
import jax.numpy as jnp
from jax.experimental import pallas as pl
from jax.experimental.pallas import tpu as pltpu


_HIDDEN = 512
_MAX_TM = 4096                   # batch-tile cap (~20 MiB/step incl. f32 intermediates)
_VMEM_LIMIT = 40 * 1024 * 1024   # covers the (TM, 512) f32 intermediate everywhere


def _round_up(x, m):
    return ((x + m - 1) // m) * m


def _evm_kernel(f_ref, a_ref, w1p_ref, b1_ref, w2_ref, b2_ref, o_ref, x_ref, *, a_off):
    F = f_ref.shape[1]
    A = a_ref.shape[1]

    # Assemble the packed layer-1 input tile in VMEM:
    #   lanes [0, F)            <- features (f32 -> bf16)
    #   lanes [a_off, a_off+A)  <- act      (a_off is 128-aligned => aligned masked store)
    #   everything else         <- 0 (multiplies the zero rows of the packed W1)
    # Zero every step: uninitialised VMEM may hold NaNs (NaN * 0 = NaN), and with
    # megacore "parallel" sharding a core may never execute grid step 0.
    x_ref[...] = jnp.zeros_like(x_ref)
    x_ref[:, 0:F] = f_ref[...].astype(x_ref.dtype)
    x_ref[:, a_off:a_off + A] = a_ref[...].astype(x_ref.dtype)

    # Layer 1: one fused bf16 MXU pass, f32 accumulation; f32 bias + ReLU on the VPU.
    h = jnp.dot(x_ref[...], w1p_ref[...], preferred_element_type=jnp.float32)
    h = jnp.maximum(h + b1_ref[...], 0.0)

    # Layer 2: bf16 operands / f32 accumulation; narrow (TM, M) bf16 store
    # (no lane padding, no wrapper-side slice afterwards).
    o = jnp.dot(h.astype(jnp.bfloat16), w2_ref[...], preferred_element_type=jnp.float32)
    o_ref[...] = jnp.maximum(o + b2_ref[...], 0.0).astype(o_ref.dtype)


def encode_visual_memory(act, features, params):
    """JAX wrapper reproducing encodeVisualMemory.forward.

    act:      (..., action_dim)  float32
    features: (..., feature_dim) float32 (or a list, first element used)
    params:   output of prepare_params()
    returns (mem, features) with mem: (B, memory_dim) bf16
    """
    if isinstance(features, (list, tuple)):
        features = features[0]

    F = params["feature_dim"]
    A = params["action_dim"]
    M = params["memory_dim"]
    H = params["hidden"]
    KP = params["k_pad"]
    a_off = params["a_off"]

    # Glue: flatten (matches the torch .view(-1, dim)); no concat, no cast pass —
    # the kernel assembles the packed input tile itself in VMEM.
    feats2d = features.reshape(-1, F)
    act2d = act.reshape(-1, A)
    B = feats2d.shape[0]

    # Batch tile: whole batch when small; otherwise guarantee >= 2 grid steps so
    # the "parallel" axis can shard across v7x's two TensorCores, cap at _MAX_TM.
    if B <= 512:
        TM = B
    else:
        TM = min(_MAX_TM, _round_up(pl.cdiv(B, 2), 256))
    grid = (pl.cdiv(B, TM),)

    flops = 2 * B * ((F + A) * H + H * M)
    bytes_accessed = (
        B * (F + A) * 4          # f32 activations in (no wrapper-side cast pass)
        + KP * H * 2             # packed bf16 W1
        + H * M * 2              # bf16 W2
        + (H + M) * 4            # f32 biases
        + B * M * 2              # narrow bf16 output
    )

    kernel = functools.partial(_evm_kernel, a_off=a_off)

    mem = pl.pallas_call(
        kernel,
        out_shape=jax.ShapeDtypeStruct((B, M), jnp.bfloat16),
        grid=grid,
        in_specs=[
            pl.BlockSpec((TM, F), lambda i: (i, 0)),   # features tile (streamed)
            pl.BlockSpec((TM, A), lambda i: (i, 0)),   # act tile (streamed)
            pl.BlockSpec((KP, H), lambda i: (0, 0)),   # packed W1 (VMEM-resident)
            pl.BlockSpec((1, H), lambda i: (0, 0)),    # b1 f32 (resident)
            pl.BlockSpec((H, M), lambda i: (0, 0)),    # W2 bf16 (resident)
            pl.BlockSpec((1, M), lambda i: (0, 0)),    # b2 f32 (resident)
        ],
        out_specs=pl.BlockSpec((TM, M), lambda i: (i, 0)),
        scratch_shapes=[pltpu.VMEM((TM, KP), jnp.bfloat16)],
        compiler_params=pltpu.CompilerParams(
            dimension_semantics=("parallel",),
            vmem_limit_bytes=_VMEM_LIMIT),
        cost_estimate=pl.CostEstimate(
            flops=int(flops), transcendentals=0,
            bytes_accessed=int(bytes_accessed)),
    )(feats2d, act2d, params["w1p"], params["b1"], params["w2"], params["b2"])

    # mem is bf16 (inference-friendly); cast downstream if f32 parity is required.
    return mem, features


def init_params(key, action_dim, memory_dim, feature_dim, hidden=_HIDDEN):
    """Deterministic synthetic parameters (PyTorch Linear init ranges),
    stored pre-transposed as (in, out) float32."""
    k1, k2, k3, k4 = jax.random.split(key, 4)
    in_dim = feature_dim + action_dim
    s1 = 1.0 / jnp.sqrt(in_dim)
    s2 = 1.0 / jnp.sqrt(hidden)
    return {
        "w1": jax.random.uniform(k1, (in_dim, hidden), jnp.float32, -s1, s1),
        "b1": jax.random.uniform(k2, (1, hidden), jnp.float32, -s1, s1),
        "w2": jax.random.uniform(k3, (hidden, memory_dim), jnp.float32, -s2, s2),
        "b2": jax.random.uniform(k4, (1, memory_dim), jnp.float32, -s2, s2),
    }


def prepare_params(params, action_dim, memory_dim, feature_dim, hidden=_HIDDEN):
    """One-time prep: pack W1 into a single (k_pad, hidden) bf16 matrix with the
    feature rows at offset 0 and the action rows at a 128-aligned offset (so the
    in-kernel tile assembly only needs lane-aligned masked stores); cast weights
    to bf16, keep biases f32."""
    a_off = _round_up(feature_dim, 128)
    k_pad = _round_up(a_off + action_dim, 128)
    w1 = params["w1"]
    w1p = jnp.zeros((k_pad, hidden), jnp.float32)
    w1p = w1p.at[:feature_dim, :].set(w1[:feature_dim, :])
    w1p = w1p.at[a_off:a_off + action_dim, :].set(w1[feature_dim:, :])
    return {
        "w1p": w1p.astype(jnp.bfloat16),
        "b1": params["b1"].astype(jnp.float32),
        "w2": params["w2"].astype(jnp.bfloat16),
        "b2": params["b2"].astype(jnp.float32),
        "action_dim": action_dim,
        "memory_dim": memory_dim,
        "feature_dim": feature_dim,
        "hidden": hidden,
        "a_off": a_off,
        "k_pad": k_pad,
    }


if __name__ == "__main__":
    action_dim, memory_dim, feature_dim = 4, 32, 64
    batch = 8

    key = jax.random.PRNGKey(0)
    kp, ka, kf = jax.random.split(key, 3)
    raw = init_params(kp, action_dim, memory_dim, feature_dim)
    pp = prepare_params(raw, action_dim, memory_dim, feature_dim)

    act = jax.random.normal(ka, (batch, action_dim), jnp.float32)
    features = jax.random.normal(kf, (batch, feature_dim), jnp.float32)

    mem, feats_out = encode_visual_memory(act, features, pp)
    jax.block_until_ready(mem)
    jax.block_until_ready(feats_out)

    mem_f32 = mem.astype(jnp.float32)

    # Reference 1: same packed bf16 operands / f32 accumulation / bf16 store.
    xp = jnp.zeros((batch, pp["k_pad"]), jnp.bfloat16)
    xp = xp.at[:, :feature_dim].set(features.astype(jnp.bfloat16))
    xp = xp.at[:, pp["a_off"]:pp["a_off"] + action_dim].set(act.astype(jnp.bfloat16))
    h = jnp.maximum(
        jnp.dot(xp, pp["w1p"], preferred_element_type=jnp.float32) + pp["b1"], 0.0)
    ref_bf = jnp.maximum(
        jnp.dot(h.astype(jnp.bfloat16), pp["w2"],
                preferred_element_type=jnp.float32) + pp["b2"], 0.0)
    ref_bf = ref_bf.astype(jnp.bfloat16).astype(jnp.float32)

    # Reference 2: full-f32 PyTorch-equivalent math (loose tolerance for bf16).
    x = jnp.concatenate([features, act], axis=-1)
    h32 = jnp.maximum(x @ raw["w1"] + raw["b1"], 0.0)
    ref_f32 = jnp.maximum(h32 @ raw["w2"] + raw["b2"], 0.0)

    assert mem.shape == (batch, memory_dim)
    assert mem.dtype == jnp.bfloat16
    assert jnp.allclose(mem_f32, ref_bf, atol=2e-2, rtol=2e-2)
    assert jnp.allclose(mem_f32, ref_f32, atol=5e-2, rtol=5e-2)
    assert jnp.array_equal(feats_out, features)

    print("KERNEL_OK")
</pallas_src>

<mosaic_0001>
module attributes {stable_mosaic.version = 11 : i64} {
  func.func @_evm_kernel(%arg0: i32, %arg1: memref<8x64xf32, #tpu.memory_space<vmem>>, %arg2: memref<8x4xf32, #tpu.memory_space<vmem>>, %arg3: memref<256x512xbf16, #tpu.memory_space<vmem>>, %arg4: memref<1x512xf32, #tpu.memory_space<vmem>>, %arg5: memref<512x32xbf16, #tpu.memory_space<vmem>>, %arg6: memref<1x32xf32, #tpu.memory_space<vmem>>, %arg7: memref<8x32xbf16, #tpu.memory_space<vmem>>, %arg8: memref<8x256xbf16, #tpu.memory_space<vmem>>) attributes {dimension_semantics = [#tpu.dimension_semantics<parallel>], iteration_bounds = array<i64: 1>, scalar_prefetch = 0 : i64, scratch_operands = 1 : i64, tpu.core_type = #tpu.core_type<tc>, window_params = [{transform_indices = @transform_0, window_bounds = array<i64: 8, 64>}, {transform_indices = @transform_1, window_bounds = array<i64: 8, 4>}, {pipeline_mode = #tpu.pipeline_mode<synchronous>, transform_indices = @transform_2, window_bounds = array<i64: 256, 512>}, {pipeline_mode = #tpu.pipeline_mode<synchronous>, transform_indices = @transform_3, window_bounds = array<i64: 1, 512>}, {pipeline_mode = #tpu.pipeline_mode<synchronous>, transform_indices = @transform_4, window_bounds = array<i64: 512, 32>}, {pipeline_mode = #tpu.pipeline_mode<synchronous>, transform_indices = @transform_5, window_bounds = array<i64: 1, 32>}, {transform_indices = @transform_6, window_bounds = array<i64: 8, 32>}]} {
    %cst = arith.constant 0.000000e+00 : bf16
    %0 = vector.broadcast %cst : bf16 to vector<8x256xbf16>
    %c0 = arith.constant 0 : index
    %c0_0 = arith.constant 0 : index
    %1 = vector.load %arg8[%c0, %c0_0] : memref<8x256xbf16, #tpu.memory_space<vmem>>, vector<8x256xbf16>
    tpu.vector_store %arg8[%c0, %c0_0], %0 {strides = array<i32>} : memref<8x256xbf16, #tpu.memory_space<vmem>>, vector<8x256xbf16>,
    %c0_1 = arith.constant 0 : index
    %c0_2 = arith.constant 0 : index
    %2 = vector.load %arg1[%c0_1, %c0_2] : memref<8x64xf32, #tpu.memory_space<vmem>>, vector<8x64xf32>
    %3 = arith.truncf %2 : vector<8x64xf32> to vector<8x64xbf16>
    %c0_3 = arith.constant 0 : index
    %c0_4 = arith.constant 0 : index
    %4 = vector.load %arg8[%c0_3, %c0_4] : memref<8x256xbf16, #tpu.memory_space<vmem>>, vector<8x64xbf16>
    tpu.vector_store %arg8[%c0_3, %c0_4], %3 {strides = array<i32>} : memref<8x256xbf16, #tpu.memory_space<vmem>>, vector<8x64xbf16>,
    %c0_5 = arith.constant 0 : index
    %c0_6 = arith.constant 0 : index
    %5 = vector.load %arg2[%c0_5, %c0_6] : memref<8x4xf32, #tpu.memory_space<vmem>>, vector<8x4xf32>
    %6 = arith.truncf %5 : vector<8x4xf32> to vector<8x4xbf16>
    %c0_7 = arith.constant 0 : index
    %c128 = arith.constant 128 : index
    %7 = vector.load %arg8[%c0_7, %c128] : memref<8x256xbf16, #tpu.memory_space<vmem>>, vector<8x4xbf16>
    tpu.vector_store %arg8[%c0_7, %c128], %6 {strides = array<i32>} : memref<8x256xbf16, #tpu.memory_space<vmem>>, vector<8x4xbf16>,
    %c0_8 = arith.constant 0 : index
    %c0_9 = arith.constant 0 : index
    %8 = vector.load %arg8[%c0_8, %c0_9] : memref<8x256xbf16, #tpu.memory_space<vmem>>, vector<8x256xbf16>
    %c0_10 = arith.constant 0 : index
    %c0_11 = arith.constant 0 : index
    %9 = vector.load %arg3[%c0_10, %c0_11] : memref<256x512xbf16, #tpu.memory_space<vmem>>, vector<256x512xbf16>
    %cst_12 = arith.constant dense<0.000000e+00> : vector<8x512xf32>
    %10 = tpu.matmul %8, %9, %cst_12 {dimension_numbers = #tpu.dot_dimension_numbers<[1], [0], [0], [1], [0, 0, 1, 1], [], []>} : vector<8x256xbf16>, vector<256x512xbf16>, vector<8x512xf32> -> vector<8x512xf32>
    %c0_13 = arith.constant 0 : index
    %c0_14 = arith.constant 0 : index
    %11 = vector.load %arg4[%c0_13, %c0_14] : memref<1x512xf32, #tpu.memory_space<vmem>>, vector<1x512xf32>
    %12 = vector.broadcast %11 : vector<1x512xf32> to vector<8x512xf32>
    %13 = arith.addf %10, %12 : vector<8x512xf32>
    %cst_15 = arith.constant 0.000000e+00 : f32
    %14 = vector.broadcast %cst_15 : f32 to vector<8x512xf32>
    %15 = arith.maximumf %13, %14 : vector<8x512xf32>
    %16 = arith.truncf %15 : vector<8x512xf32> to vector<8x512xbf16>
    %c0_16 = arith.constant 0 : index
    %c0_17 = arith.constant 0 : index
    %17 = vector.load %arg5[%c0_16, %c0_17] : memref<512x32xbf16, #tpu.memory_space<vmem>>, vector<512x32xbf16>
    %cst_18 = arith.constant dense<0.000000e+00> : vector<8x32xf32>
    %18 = tpu.matmul %16, %17, %cst_18 {dimension_numbers = #tpu.dot_dimension_numbers<[1], [0], [0], [1], [0, 0, 1, 1], [], []>} : vector<8x512xbf16>, vector<512x32xbf16>, vector<8x32xf32> -> vector<8x32xf32>
    %c0_19 = arith.constant 0 : index
    %c0_20 = arith.constant 0 : index
    %19 = vector.load %arg6[%c0_19, %c0_20] : memref<1x32xf32, #tpu.memory_space<vmem>>, vector<1x32xf32>
    %20 = vector.broadcast %19 : vector<1x32xf32> to vector<8x32xf32>
    %21 = arith.addf %18, %20 : vector<8x32xf32>
    %cst_21 = arith.constant 0.000000e+00 : f32
    %22 = vector.broadcast %cst_21 : f32 to vector<8x32xf32>
    %23 = arith.maximumf %21, %22 : vector<8x32xf32>
    %24 = arith.truncf %23 : vector<8x32xf32> to vector<8x32xbf16>
    %c0_22 = arith.constant 0 : index
    %c0_23 = arith.constant 0 : index
    %25 = vector.load %arg7[%c0_22, %c0_23] : memref<8x32xbf16, #tpu.memory_space<vmem>>, vector<8x32xbf16>
    tpu.vector_store %arg7[%c0_22, %c0_23], %24 {strides = array<i32>} : memref<8x32xbf16, #tpu.memory_space<vmem>>, vector<8x32xbf16>,
    return
  }
  func.func @transform_0(%arg0: i32) -> (i32, i32) {
    %c0_i32 = arith.constant 0 : i32
    %c0_i32_0 = arith.constant 0 : i32
    return %arg0, %c0_i32 : i32, i32
  }
  func.func @transform_1(%arg0: i32) -> (i32, i32) {
    %c0_i32 = arith.constant 0 : i32
    %c0_i32_0 = arith.constant 0 : i32
    return %arg0, %c0_i32 : i32, i32
  }
  func.func @transform_2(%arg0: i32) -> (i32, i32) {
    %c0_i32 = arith.constant 0 : i32
    %c0_i32_0 = arith.constant 0 : i32
    %c0_i32_1 = arith.constant 0 : i32
    return %c0_i32, %c0_i32_0 : i32, i32
  }
  func.func @transform_3(%arg0: i32) -> (i32, i32) {
    %c0_i32 = arith.constant 0 : i32
    %c0_i32_0 = arith.constant 0 : i32
    %c0_i32_1 = arith.constant 0 : i32
    return %c0_i32, %c0_i32_0 : i32, i32
  }
  func.func @transform_4(%arg0: i32) -> (i32, i32) {
    %c0_i32 = arith.constant 0 : i32
    %c0_i32_0 = arith.constant 0 : i32
    %c0_i32_1 = arith.constant 0 : i32
    return %c0_i32, %c0_i32_0 : i32, i32
  }
  func.func @transform_5(%arg0: i32) -> (i32, i32) {
    %c0_i32 = arith.constant 0 : i32
    %c0_i32_0 = arith.constant 0 : i32
    %c0_i32_1 = arith.constant 0 : i32
    return %c0_i32, %c0_i32_0 : i32, i32
  }
  func.func @transform_6(%arg0: i32) -> (i32, i32) {
    %c0_i32 = arith.constant 0 : i32
    %c0_i32_0 = arith.constant 0 : i32
    return %arg0, %c0_i32 : i32, i32
  }
}

</mosaic_0001>

<bundles_post_ra>
// kernel: tpu_custom_call.1
= control target key start
LH: loop header
LB: loop body
LE: loop exit
PB: predicated region body
PF: predicated region fallthrough
CT: control target
= control target key end

     0   :  { %11 = vsyncpa [#allocation4], 0  ;;  %s1603_s0 = inlined_call_operand.vmem [shape: f32[8,64], index: 0, kind: input, shape index: {}]   ;;  %s1604_s1 = inlined_call_operand.vmem [shape: f32[8,4], index: 1, kind: input, shape index: {}]   ;;  %s1605_s2 = inlined_call_operand.hbm [shape: bf16[256,512], index: 2, kind: input, shape index: {}]   ;;  %s1606_s3 = inlined_call_operand.vmem [shape: f32[1,512], index: 3, kind: input, shape index: {}]   ;;  %s1607_s4 = inlined_call_operand.vmem [shape: bf16[512,32], index: 4, kind: input, shape index: {}]   ;;  %s1608_s5 = inlined_call_operand.vmem [shape: f32[1,32], index: 5, kind: input, shape index: {}]   ;;  %s1609_s6 = inlined_call_operand.hbm [shape: bf16[8,32], index: 6, kind: output, shape index: {}]  }
   0x1   :  { %12 = vsyncpa [#allocation5], 0  ;;  %s21_s23 = sshll.u32 %s1605_s2, 4  ;;  %s1435_s24 = smov [#allocation3]   ;;  %s22_s23 = int_to_ptr.hbm [resolvable:$true] %s21_s23 }
   0x2   :  { %s23_s25 = sshll.u32 %s1435_s24, 4  ;;  %s1436_s26 = smov 256   ;;  %s24_s25 = int_to_ptr.vmem [resolvable:$true] %s23_s25 }
   0x3   :  { %s1437_s27 = smov 16  }
   0x4   :  { %29 = dma.hbm_to_vmem [thread:$0]  %s22_s23, 8192, %s24_s25, [#allocation4], %s1436_s26, %s1436_s26, %s1437_s27  }
   0x5   :  { %1431 = dma.done.wait [#allocation4], 8192  }
   0x6   :  { %1432 = vsyncadd [#allocation4], 4294959104  ;;  %v1438_v0 = vmov 0   ;;  %v1011_v1 = vld [vmem:[#allocation3 + $0xe0] sm:$0xf]  ;;  %vm44_vm0 = vcmask 519168  }
   0x7   :  { %41 = vst [vmem:[#allocation2] sm:$0xff] %v1438_v0  ;;  %v1311_v2 = vld [vmem:[#allocation3 + $0xec] sm:$0xf0]  ;;  %v1139_v3 = vld [vmem:[#allocation3 + $0x1e0] sm:$0xf]  ;;  %vm48_vm1 = vcmask 27648  }
   0x8   :  { %v1012_v4 = vor.u32 %v1311_v2, %v1011_v1  ;;  %v1343_v5 = vld [vmem:[#allocation3 + $0x1ec] sm:$0xf0]  ;;  %v1309_v6 = vld [vmem:[#allocation3 + $0xe4] sm:$0xf]  ;;  %v1013_v7 = vld [vmem:[#allocation3 + $0xf0] sm:$0xf0] }
   0x9   :  { %v1140_v8 = vor.u32 %v1343_v5, %v1139_v3  ;;  %v1016_v9 = vor.u32 %v1309_v6, %v1013_v7  ;;  %v1341_v10 = vld [vmem:[#allocation3 + $0x1e4] sm:$0xf]  ;;  %v1141_v11 = vld [vmem:[#allocation3 + $0x1f0] sm:$0xf0]  ;;  %v995_v12 = vld [vmem:[#allocation3 + $0xc0] sm:$0xf] }
   0xa   :  { %452 = vmatpush.bf16.msra.mxu0 %v1012_v4  ;;  %v1144_v13 = vor.u32 %v1341_v10, %v1141_v11  ;;  %v1307_v14 = vld [vmem:[#allocation3 + $0xcc] sm:$0xf0]  ;;  %v1123_v15 = vld [vmem:[#allocation3 + $0x1c0] sm:$0xf]  ;;  %v1305_v19 = vld [vmem:[#allocation3 + $0xc4] sm:$0xf] }
   0xb   :  { %v1339_v16 = vld [vmem:[#allocation3 + $0x1cc] sm:$0xf0]  ;;  %465 = vmatpush.bf16.msra.mxu1 %v1140_v8  ;;  %478 = vmatpush.bf16.msra.mxu2 %v1016_v9  ;;  %v996_v17 = vor.u32 %v1307_v14, %v995_v12  ;;  %v997_v20 = vld [vmem:[#allocation3 + $0xd0] sm:$0xf0]  ;;  %v1337_v21 = vld [vmem:[#allocation3 + $0x1c4] sm:$0xf] }
   0xc   :  { %v1124_v18 = vor.u32 %v1339_v16, %v1123_v15  ;;  %491 = vmatpush.bf16.msra.mxu3 %v1144_v13  ;;  %v1000_v22 = vor.u32 %v1305_v19, %v997_v20  ;;  %v1125_v23 = vld [vmem:[#allocation3 + $0x1d0] sm:$0xf0]  ;;  %v979_v24 = vld [vmem:[#allocation3 + $0xa0] sm:$0xf]  ;;  %v1303_v25 = vld [vmem:[#allocation3 + $0xac] sm:$0xf0] }
   0xd   :  { %v1128_v26 = vor.u32 %v1337_v21, %v1125_v23  ;;  %v1107_v27 = vld [vmem:[#allocation3 + $0x1a0] sm:$0xf]  ;;  %v1335_v28 = vld [vmem:[#allocation3 + $0x1ac] sm:$0xf0]  ;;  %v1301_v29 = vld [vmem:[#allocation3 + $0xa4] sm:$0xf]  ;;  %v980_v30 = vor.u32 %v1303_v25, %v979_v24 }
   0xe   :  { %453 = vmatpush.bf16.msra.mxu0 %v996_v17  ;;  %v981_v31 = vld [vmem:[#allocation3 + $0xb0] sm:$0xf0]  ;;  %v1333_v32 = vld [vmem:[#allocation3 + $0x1a4] sm:$0xf]  ;;  %v1108_v34 = vor.u32 %v1335_v28, %v1107_v27  ;;  %v963_v36 = vld [vmem:[#allocation3 + $0x80] sm:$0xf] }
   0xf   :  { %v1109_v33 = vld [vmem:[#allocation3 + $0x1b0] sm:$0xf0]  ;;  %466 = vmatpush.bf16.msra.mxu1 %v1124_v18  ;;  %479 = vmatpush.bf16.msra.mxu2 %v1000_v22  ;;  %v984_v35 = vor.u32 %v1301_v29, %v981_v31  ;;  %v1299_v37 = vld [vmem:[#allocation3 + $0x8c] sm:$0xf0]  ;;  %v1091_v38 = vld [vmem:[#allocation3 + $0x180] sm:$0xf] }
  0x10   :  { %492 = vmatpush.bf16.msra.mxu3 %v1128_v26  ;;  %v1112_v39 = vor.u32 %v1333_v32, %v1109_v33  ;;  %v1331_v40 = vld [vmem:[#allocation3 + $0x18c] sm:$0xf0]  ;;  %v1297_v41 = vld [vmem:[#allocation3 + $0x84] sm:$0xf]  ;;  %v965_v42 = vld [vmem:[#allocation3 + $0x90] sm:$0xf0]  ;;  %v964_v45 = vor.u32 %v1299_v37, %v963_v36 }
  0x11   :  { %v1329_v43 = vld [vmem:[#allocation3 + $0x184] sm:$0xf]  ;;  %v1093_v44 = vld [vmem:[#allocation3 + $0x190] sm:$0xf0]  ;;  %v1092_v46 = vor.u32 %v1331_v40, %v1091_v38  ;;  %v968_v47 = vor.u32 %v1297_v41, %v965_v42  ;;  %v947_v48 = vld [vmem:[#allocation3 + $0x60] sm:$0xf] }
  0x12   :  { %454 = vmatpush.bf16.msra.mxu0 %v980_v30  ;;  %v1295_v49 = vld [vmem:[#allocation3 + $0x6c] sm:$0xf0]  ;;  %v1075_v50 = vld [vmem:[#allocation3 + $0x160] sm:$0xf]  ;;  %v1096_v51 = vor.u32 %v1329_v43, %v1093_v44  ;;  %v1293_v53 = vld [vmem:[#allocation3 + $0x64] sm:$0xf] }
  0x13   :  { %467 = vmatpush.bf16.msra.mxu1 %v1108_v34  ;;  %480 = vmatpush.bf16.msra.mxu2 %v984_v35  ;;  %v1327_v52 = vld [vmem:[#allocation3 + $0x16c] sm:$0xf0]  ;;  %v949_v54 = vld [vmem:[#allocation3 + $0x70] sm:$0xf0]  ;;  %v1325_v55 = vld [vmem:[#allocation3 + $0x164] sm:$0xf]  ;;  %v948_v57 = vor.u32 %v1295_v49, %v947_v48 }
  0x14   :  { %493 = vmatpush.bf16.msra.mxu3 %v1112_v39  ;;  %v1077_v56 = vld [vmem:[#allocation3 + $0x170] sm:$0xf0]  ;;  %v1076_v58 = vor.u32 %v1327_v52, %v1075_v50  ;;  %v952_v59 = vor.u32 %v1293_v53, %v949_v54  ;;  %v931_v60 = vld [vmem:[#allocation3 + $0x40] sm:$0xf]  ;;  %v1291_v61 = vld [vmem:[#allocation3 + $0x4c] sm:$0xf0] }
  0x15   :  { %v1059_v62 = vld [vmem:[#allocation3 + $0x140] sm:$0xf]  ;;  %v1080_v63 = vor.u32 %v1325_v55, %v1077_v56  ;;  %v1323_v0 = vld [vmem:[#allocation3 + $0x14c] sm:$0xf0]  ;;  %v1289_v1 = vld [vmem:[#allocation3 + $0x44] sm:$0xf]  ;;  %v932_v5 = vor.u32 %v1291_v61, %v931_v60 }
  0x16   :  { %455 = vmatpush.bf16.msra.mxu0 %v964_v45  ;;  %v933_v2 = vld [vmem:[#allocation3 + $0x50] sm:$0xf0]  ;;  %v1321_v3 = vld [vmem:[#allocation3 + $0x144] sm:$0xf]  ;;  %v1060_v6 = vor.u32 %v1323_v0, %v1059_v62  ;;  %v915_v8 = vld [vmem:[#allocation3 + $0x20] sm:$0xf] }
  0x17   :  { %468 = vmatpush.bf16.msra.mxu1 %v1092_v46  ;;  %481 = vmatpush.bf16.msra.mxu2 %v968_v47  ;;  %v1061_v4 = vld [vmem:[#allocation3 + $0x150] sm:$0xf0]  ;;  %v936_v7 = vor.u32 %v1289_v1, %v933_v2  ;;  %v1287_v9 = vld [vmem:[#allocation3 + $0x2c] sm:$0xf0]  ;;  %v1043_v10 = vld [vmem:[#allocation3 + $0x120] sm:$0xf] }
  0x18   :  { %494 = vmatpush.bf16.msra.mxu3 %v1096_v51  ;;  %v1064_v11 = vor.u32 %v1321_v3, %v1061_v4  ;;  %v1319_v12 = vld [vmem:[#allocation3 + $0x12c] sm:$0xf0]  ;;  %v1285_v13 = vld [vmem:[#allocation3 + $0x24] sm:$0xf]  ;;  %v917_v14 = vld [vmem:[#allocation3 + $0x30] sm:$0xf0]  ;;  %v916_v18 = vor.u32 %v1287_v9, %v915_v8 }
  0x19   :  { %v1317_v15 = vld [vmem:[#allocation3 + $0x124] sm:$0xf]  ;;  %v1045_v16 = vld [vmem:[#allocation3 + $0x130] sm:$0xf0]  ;;  %v899_v17 = vld [vmem:[#allocation3] sm:$0xf]  ;;  %v1044_v22 = vor.u32 %v1319_v12, %v1043_v10  ;;  %v920_v23 = vor.u32 %v1285_v13, %v917_v14 }
  0x1a   :  { %456 = vmatpush.bf16.msra.mxu0 %v948_v57  ;;  %v1283_v19 = vld [vmem:[#allocation3 + $0xc] sm:$0xf0]  ;;  %v1027_v20 = vld [vmem:[#allocation3 + $0x100] sm:$0xf]  ;;  %v1281_v24 = vld [vmem:[#allocation3 + $0x4] sm:$0xf]  ;;  %v1048_v27 = vor.u32 %v1317_v15, %v1045_v16 }
  0x1b   :  { %469 = vmatpush.bf16.msra.mxu1 %v1076_v58  ;;  %482 = vmatpush.bf16.msra.mxu2 %v952_v59  ;;  %v1315_v21 = vld [vmem:[#allocation3 + $0x10c] sm:$0xf0]  ;;  %v901_v25 = vld [vmem:[#allocation3 + $0x10] sm:$0xf0]  ;;  %v1313_v26 = vld [vmem:[#allocation3 + $0x104] sm:$0xf]  ;;  %v900_v34 = vor.u32 %v1283_v19, %v899_v17 }
  0x1c   :  { %495 = vmatpush.bf16.msra.mxu3 %v1080_v63  ;;  %v1029_v28 = vld [vmem:[#allocation3 + $0x110] sm:$0xf0]  ;;  %v1019_v29 = vld [vmem:[#allocation3 + $0xe8] sm:$0xf]  ;;  %v1312_v30 = vld [vmem:[#allocation3 + $0xf4] sm:$0xf0]  ;;  %v1028_v39 = vor.u32 %v1315_v21, %v1027_v20  ;;  %v904_v40 = vor.u32 %v1281_v24, %v901_v25 }
  0x1d   :  { %v1147_v31 = vld [vmem:[#allocation3 + $0x1e8] sm:$0xf]  ;;  %v1344_v32 = vld [vmem:[#allocation3 + $0x1f4] sm:$0xf0]  ;;  %v1310_v35 = vld [vmem:[#allocation3 + $0xec] sm:$0xf]  ;;  %v1032_v44 = vor.u32 %v1313_v26, %v1029_v28  ;;  %v1020_v45 = vor.u32 %v1312_v30, %v1019_v29 }
  0x1e   :  { %457 = vmatpush.bf16.msra.mxu0 %v932_v5  ;;  %v42_v33 = vld [vmem:[%s1603_s0] sm:$0xff]  ;;  %v1342_v41 = vld [vmem:[#allocation3 + $0x1ec] sm:$0xf]  ;;  %v1003_v46 = vld [vmem:[#allocation3 + $0xc8] sm:$0xf]  ;;  %v1148_v47 = vor.u32 %v1344_v32, %v1147_v31  ;;  %s1439_s17 = smov [#allocation6]  }
  0x1f   :  { %470 = vmatpush.bf16.msra.mxu1 %v1060_v6  ;;  %483 = vmatpush.bf16.msra.mxu2 %v936_v7  ;;  %v1021_v36 = vld [vmem:[#allocation3 + $0xf8] sm:$0xf0]  ;;  %v43_v37 = vpack.c.bf16 %v42_v33, %v42_v33  ;;  %v1308_v49 = vld [vmem:[#allocation3 + $0xd4] sm:$0xf0]  ;;  %v1131_v50 = vld [vmem:[#allocation3 + $0x1c8] sm:$0xf] }
  0x20   :  { %496 = vmatpush.bf16.msra.mxu3 %v1064_v11  ;;  %v46_v38 = vld [vmem:[%s1604_s1] sm:$0xff]  ;;  %v1024_v48 = vor.u32 %v1310_v35, %v1021_v36  ;;  %v1306_v53 = vld [vmem:[#allocation3 + $0xcc] sm:$0xf]  ;;  %v1004_v57 = vor.u32 %v1308_v49, %v1003_v46  ;;  %v987_v60 = vld [vmem:[#allocation3 + $0xa8] sm:$0xf]  ;;  %s885_s18 = sshll.u32 %s1439_s17, 4  ;;  %s886_s18 = int_to_ptr.vmem [resolvable:$true] %s885_s18 }
  0x21   :  { %v1149_v42 = vld [vmem:[#allocation3 + $0x1f8] sm:$0xf0]  ;;  %v47_v43 = vpack.c.bf16 %v46_v38, %v46_v38  ;;  %45 = vst.msk [vmem:[#allocation2] sm:$0xf] %vm44_vm0, %v43_v37  ;;  %v1340_v52 = vld [vmem:[#allocation3 + $0x1d4] sm:$0xf0] }
  0x22   :  { %458 = vmatpush.bf16.msra.mxu0 %v916_v18  ;;  %v1152_v51 = vor.u32 %v1342_v41, %v1149_v42  ;;  %v1005_v54 = vld [vmem:[#allocation3 + $0xd8] sm:$0xf0]  ;;  %v1338_v55 = vld [vmem:[#allocation3 + $0x1cc] sm:$0xf]  ;;  %v1132_v58 = vor.u32 %v1340_v52, %v1131_v50  ;;  %v1304_v61 = vld [vmem:[#allocation3 + $0xb4] sm:$0xf0] }
  0x23   :  { %471 = vmatpush.bf16.msra.mxu1 %v1044_v22  ;;  %484 = vmatpush.bf16.msra.mxu2 %v920_v23  ;;  %49 = vst.msk [vmem:[#allocation2 + $0x4] sm:$0xf] %vm48_vm1, %v47_v43  ;;  %v1133_v56 = vld [vmem:[#allocation3 + $0x1d8] sm:$0xf0]  ;;  %v1008_v59 = vor.u32 %v1306_v53, %v1005_v54  ;;  %v1115_v63 = vld [vmem:[#allocation3 + $0x1a8] sm:$0xf]  ;;  %v988_v6 = vor.u32 %v1304_v61, %v987_v60 }
  0x24   :  { %497 = vmatpush.bf16.msra.mxu3 %v1048_v27  ;;  %v1136_v62 = vor.u32 %v1338_v55, %v1133_v56  ;;  %v1336_v0 = vld [vmem:[#allocation3 + $0x1b4] sm:$0xf0]  ;;  %v1302_v1 = vld [vmem:[#allocation3 + $0xac] sm:$0xf]  ;;  %v989_v2 = vld [vmem:[#allocation3 + $0xb8] sm:$0xf0] }
  0x25   :  { %v1334_v3 = vld [vmem:[#allocation3 + $0x1ac] sm:$0xf]  ;;  %v1117_v4 = vld [vmem:[#allocation3 + $0x1b8] sm:$0xf0]  ;;  %v1116_v8 = vor.u32 %v1336_v0, %v1115_v63  ;;  %v971_v10 = vld [vmem:[#allocation3 + $0x88] sm:$0xf]  ;;  %v992_v12 = vor.u32 %v1302_v1, %v989_v2 }
  0x26   :  { %459 = vmatpush.bf16.msra.mxu0 %v900_v34  ;;  %v1300_v11 = vld [vmem:[#allocation3 + $0x94] sm:$0xf0]  ;;  %v1120_v13 = vor.u32 %v1334_v3, %v1117_v4  ;;  %v1099_v14 = vld [vmem:[#allocation3 + $0x188] sm:$0xf]  ;;  %v1298_v16 = vld [vmem:[#allocation3 + $0x8c] sm:$0xf] }
  0x27   :  { %472 = vmatpush.bf16.msra.mxu1 %v1028_v39  ;;  %485 = vmatpush.bf16.msra.mxu2 %v904_v40  ;;  %v1332_v15 = vld [vmem:[#allocation3 + $0x194] sm:$0xf0]  ;;  %v973_v19 = vld [vmem:[#allocation3 + $0x98] sm:$0xf0]  ;;  %v1330_v20 = vld [vmem:[#allocation3 + $0x18c] sm:$0xf]  ;;  %v972_v22 = vor.u32 %v1300_v11, %v971_v10 }
  0x28   :  { %498 = vmatpush.bf16.msra.mxu3 %v1032_v44  ;;  %v1101_v21 = vld [vmem:[#allocation3 + $0x198] sm:$0xf0]  ;;  %v1100_v23 = vor.u32 %v1332_v15, %v1099_v14  ;;  %v955_v24 = vld [vmem:[#allocation3 + $0x68] sm:$0xf]  ;;  %v1296_v25 = vld [vmem:[#allocation3 + $0x74] sm:$0xf0]  ;;  %v976_v26 = vor.u32 %v1298_v16, %v973_v19 }
  0x29   :  { %v1104_v27 = vor.u32 %v1330_v20, %v1101_v21  ;;  %v1083_v28 = vld [vmem:[#allocation3 + $0x168] sm:$0xf]  ;;  %v1328_v29 = vld [vmem:[#allocation3 + $0x174] sm:$0xf0]  ;;  %v1294_v30 = vld [vmem:[#allocation3 + $0x6c] sm:$0xf]  ;;  %v956_v34 = vor.u32 %v1296_v25, %v955_v24 }
  0x2a   :  { %504 = vmatpush.bf16.msrb.mxu0 %v1020_v45  ;;  %v50_v5 = vld [vmem:[#allocation2] sm:$0xff]  ;;  %v1326_v32 = vld [vmem:[#allocation3 + $0x16c] sm:$0xf]  ;;  %v1084_v35 = vor.u32 %v1328_v29, %v1083_v28  ;;  %v939_v36 = vld [vmem:[#allocation3 + $0x48] sm:$0xf]  ;;  %s887_s21 = sshll.u32 %s1609_s6, 4  ;;  %s888_s21 = int_to_ptr.hbm [resolvable:$true] %s887_s21 }
  0x2b   :  { %517 = vmatpush.bf16.msrb.mxu1 %v1148_v47  ;;  %530 = vmatpush.bf16.msrb.mxu2 %v1024_v48  ;;  %v126_v7 = vunpack.c.l.b16 %v50_v5  ;;  %v127_v9 = vunpack.c.h.b16 %v50_v5  ;;  %v957_v31 = vld [vmem:[#allocation3 + $0x78] sm:$0xf0]  ;;  %v1292_v37 = vld [vmem:[#allocation3 + $0x54] sm:$0xf0]  ;;  %v1067_v38 = vld [vmem:[#allocation3 + $0x148] sm:$0xf] }
  0x2c   :  { %543 = vmatpush.bf16.msrb.mxu3 %v1152_v51  ;;  %v1085_v33 = vld [vmem:[#allocation3 + $0x178] sm:$0xf0]  ;;  %v960_v39 = vor.u32 %v1294_v30, %v957_v31  ;;  %v1324_v41 = vld [vmem:[#allocation3 + $0x154] sm:$0xf0]  ;;  %v1290_v42 = vld [vmem:[#allocation3 + $0x4c] sm:$0xf]  ;;  %v940_v46 = vor.u32 %v1292_v37, %v939_v36 }
  0x2d   :  { %v1486_v17 = vpack.c.b16 %v126_v7, %v126_v7  ;;  %v1488_v18 = vpack.c.b16 %v127_v9, %v127_v9  ;;  %v1088_v40 = vor.u32 %v1326_v32, %v1085_v33  ;;  %v941_v43 = vld [vmem:[#allocation3 + $0x58] sm:$0xf0]  ;;  %v1322_v44 = vld [vmem:[#allocation3 + $0x14c] sm:$0xf]  ;;  %v1068_v47 = vor.u32 %v1324_v41, %v1067_v38  ;;  %v923_v48 = vld [vmem:[#allocation3 + $0x28] sm:$0xf] }
  0x2e   :  { %505 = vmatpush.bf16.msrb.mxu0 %v1004_v57  ;;  %v1069_v45 = vld [vmem:[#allocation3 + $0x158] sm:$0xf0]  ;;  %v1288_v49 = vld [vmem:[#allocation3 + $0x34] sm:$0xf0]  ;;  %v944_v50 = vor.u32 %v1290_v42, %v941_v43  ;;  %v1051_v52 = vld [vmem:[#allocation3 + $0x128] sm:$0xf] }
  0x2f   :  { %518 = vmatpush.bf16.msrb.mxu1 %v1132_v58  ;;  %531 = vmatpush.bf16.msrb.mxu2 %v1008_v59  ;;  %v1072_v51 = vor.u32 %v1322_v44, %v1069_v45  ;;  %v1320_v53 = vld [vmem:[#allocation3 + $0x134] sm:$0xf0]  ;;  %v1286_v54 = vld [vmem:[#allocation3 + $0x2c] sm:$0xf]  ;;  %v925_v55 = vld [vmem:[#allocation3 + $0x38] sm:$0xf0]  ;;  %v924_v58 = vor.u32 %v1288_v49, %v923_v48 }
  0x30   :  { %544 = vmatpush.bf16.msrb.mxu3 %v1136_v62  ;;  %486 = vmatmul.bf16.vlgmr.msra.gmra.mxu2 %v1486_v17  ;;  %v1318_v56 = vld [vmem:[#allocation3 + $0x12c] sm:$0xf]  ;;  %v1053_v57 = vld [vmem:[#allocation3 + $0x138] sm:$0xf0]  ;;  %v1052_v59 = vor.u32 %v1320_v53, %v1051_v52  ;;  %v907_v60 = vld [vmem:[#allocation3 + $0x8] sm:$0xf]  ;;  %v928_v62 = vor.u32 %v1286_v54, %v925_v55 }
  0x31   :  { %499 = vmatmul.bf16.vlgmr.msra.gmra.mxu3 %v1488_v18  ;;  %460 = vmatmul.bf16.vlgmr.msra.gmra.mxu0 %v1486_v17  ;;  %v1284_v61 = vld [vmem:[#allocation3 + $0x14] sm:$0xf0]  ;;  %v1056_v63 = vor.u32 %v1318_v56, %v1053_v57  ;;  %v1035_v0 = vld [vmem:[#allocation3 + $0x108] sm:$0xf]  ;;  %v1282_v2 = vld [vmem:[#allocation3 + $0xc] sm:$0xf] }
  0x32   :  { %506 = vmatpush.bf16.msrb.mxu0 %v988_v6  ;;  %473 = vmatmul.bf16.vlgmr.msra.gmra.mxu1 %v1488_v18  ;;  %v1316_v1 = vld [vmem:[#allocation3 + $0x114] sm:$0xf0]  ;;  %v909_v3 = vld [vmem:[#allocation3 + $0x18] sm:$0xf0]  ;;  %v1314_v4 = vld [vmem:[#allocation3 + $0x10c] sm:$0xf]  ;;  %v908_v6 = vor.u32 %v1284_v61, %v907_v60 }
  0x33   :  { %519 = vmatpush.bf16.msrb.mxu1 %v1116_v8  ;;  %532 = vmatpush.bf16.msrb.mxu2 %v992_v12  ;;  %v1037_v5 = vld [vmem:[#allocation3 + $0x118] sm:$0xf0]  ;;  %v1036_v7 = vor.u32 %v1316_v1, %v1035_v0  ;;  %v1352_v8 = vld [vmem:[%s1607_s4 + $0x38] sm:$0xff]  ;;  %v912_v9 = vor.u32 %v1282_v2, %v909_v3  ;;  %v1359_v14 = vld [vmem:[%s1607_s4 + $0x70] sm:$0xff]  ;;  %vm878_vm2 = vcmask 257024  }
  0x34   :  { %545 = vmatpush.bf16.msrb.mxu3 %v1120_v13  ;;  %v1040_v10 = vor.u32 %v1314_v4, %v1037_v5  ;;  %v1360_v11 = vld [vmem:[%s1607_s4 + $0x78] sm:$0xff]  ;;  %v1351_v13 = vld [vmem:[%s1607_s4 + $0x30] sm:$0xff]  ;;  %v1350_v15 = vld [vmem:[%s1607_s4 + $0x28] sm:$0xff] }
  0x35   :  { %v1368_v12 = vld [vmem:[%s1607_s4 + $0xb8] sm:$0xff]  ;;  %v1358_v16 = vld [vmem:[%s1607_s4 + $0x68] sm:$0xff]  ;;  %v1349_v19 = vld [vmem:[%s1607_s4 + $0x20] sm:$0xff] }
  0x36   :  { %507 = vmatpush.bf16.msrb.mxu0 %v972_v22  ;;  %v1356_v20 = vld [vmem:[%s1607_s4 + $0x58] sm:$0xff]  ;;  %v1347_v21 = vld [vmem:[%s1607_s4 + $0x10] sm:$0xff]  ;;  %v1354_v25 = vld [vmem:[%s1607_s4 + $0x48] sm:$0xff] }
  0x37   :  { %520 = vmatpush.bf16.msrb.mxu1 %v1100_v23  ;;  %533 = vmatpush.bf16.msrb.mxu2 %v976_v26  ;;  %v1355_v22 = vld [vmem:[%s1607_s4 + $0x50] sm:$0xff]  ;;  %v1346_v23 = vld [vmem:[%s1607_s4 + $0x8] sm:$0xff]  ;;  %v1376_v26 = vld [vmem:[%s1607_s4 + $0xf8] sm:$0xff] }
  0x38   :  { %546 = vmatpush.bf16.msrb.mxu3 %v1104_v27  ;;  %v1367_v24 = vld [vmem:[%s1607_s4 + $0xb0] sm:$0xff]  ;;  %v1345_v27 = vld [vmem:[%s1607_s4] sm:$0xff]  ;;  %v1366_v28 = vld [vmem:[%s1607_s4 + $0xa8] sm:$0xff] }
  0x39   :  { %v1353_v29 = vld [vmem:[%s1607_s4 + $0x40] sm:$0xff]  ;;  %v1375_v30 = vld [vmem:[%s1607_s4 + $0xf0] sm:$0xff]  ;;  %v1374_v32 = vld [vmem:[%s1607_s4 + $0xe8] sm:$0xff] }
  0x3a   :  { %508 = vmatpush.bf16.msrb.mxu0 %v956_v34  ;;  %v1365_v31 = vld [vmem:[%s1607_s4 + $0xa0] sm:$0xff]  ;;  %v1364_v33 = vld [vmem:[%s1607_s4 + $0x98] sm:$0xff]  ;;  %v1362_v37 = vld [vmem:[%s1607_s4 + $0x88] sm:$0xff] }
  0x3b   :  { %521 = vmatpush.bf16.msrb.mxu1 %v1084_v35  ;;  %534 = vmatpush.bf16.msrb.mxu2 %v960_v39  ;;  %v1373_v34 = vld [vmem:[%s1607_s4 + $0xe0] sm:$0xff]  ;;  %v1363_v35 = vld [vmem:[%s1607_s4 + $0x90] sm:$0xff]  ;;  %v1372_v36 = vld [vmem:[%s1607_s4 + $0xd8] sm:$0xff] }
  0x3c   :  { %547 = vmatpush.bf16.msrb.mxu3 %v1088_v40  ;;  %v1371_v38 = vld [vmem:[%s1607_s4 + $0xd0] sm:$0xff]  ;;  %v115_v39 = vld [vmem:[%s1606_s3] sm:$0xf]  ;;  %v1370_v41 = vld [vmem:[%s1607_s4 + $0xc8] sm:$0xff] }
  0x3d   :  { %v1361_v40 = vld [vmem:[%s1607_s4 + $0x80] sm:$0xff]  ;;  %v117_v42 = vperm.slane %v115_v39, 0  ;;  %v119_v61 = vperm.slane %v115_v39, 2  ;;  %v120_v3 = vperm.slane %v115_v39, 3 }
  0x3e   :  { %509 = vmatpush.bf16.msrb.mxu0 %v940_v46  ;;  %v1369_v44 = vld [vmem:[%s1607_s4 + $0xc0] sm:$0xff] }
  0x3f   :  { %522 = vmatpush.bf16.msrb.mxu1 %v1068_v47  ;;  %535 = vmatpush.bf16.msrb.mxu2 %v944_v50  ;;  %v118_v47 = vperm.slane %v115_v39, 1 }
  0x40   :  { %548 = vmatpush.bf16.msrb.mxu3 %v1072_v51 }
  0x42   :  { %510 = vmatpush.bf16.msrb.mxu0 %v924_v58 }
  0x43   :  { %523 = vmatpush.bf16.msrb.mxu1 %v1052_v59  ;;  %536 = vmatpush.bf16.msrb.mxu2 %v928_v62 }
  0x44   :  { %549 = vmatpush.bf16.msrb.mxu3 %v1056_v63 }
  0x46   :  { %511 = vmatpush.bf16.msrb.mxu0 %v908_v6 }
  0x47   :  { %524 = vmatpush.bf16.msrb.mxu1 %v1036_v7  ;;  %537 = vmatpush.bf16.msrb.mxu2 %v912_v9 }
  0x48   :  { %550 = vmatpush.bf16.msrb.mxu3 %v1040_v10 }
  0x49   :  { %512 = vmatmul.bf16.vlgmr.msrb.gmra.mxu0 %v1486_v17 }
  0x4a   :  { %824 = vmatpush.bf16.msra.mxu0 %v1352_v8  ;;  %525 = vmatmul.bf16.vlgmr.msrb.gmra.mxu1 %v1488_v18 }
  0x4b   :  { %837 = vmatpush.bf16.msra.mxu1 %v1360_v11  ;;  %850 = vmatpush.bf16.msra.mxu2 %v1368_v12 }
  0x4c   :  { %538 = vmatmul.bf16.vlgmr.msrb.gmra.mxu2 %v1486_v17  ;;  %551 = vmatmul.bf16.vlgmr.msrb.gmra.mxu3 %v1488_v18  ;;  %v1357_v17 = vld [vmem:[%s1607_s4 + $0x60] sm:$0xff]  ;;  %v1348_v18 = vld [vmem:[%s1607_s4 + $0x18] sm:$0xff] }
  0x4d   :  { %863 = vmatpush.bf16.msra.mxu3 %v1376_v26 }
  0x4e   :  { %825 = vmatpush.bf16.msra.mxu0 %v1351_v13 }
  0x4f   :  { %838 = vmatpush.bf16.msra.mxu1 %v1359_v14  ;;  %851 = vmatpush.bf16.msra.mxu2 %v1367_v24 }
  0x51   :  { %864 = vmatpush.bf16.msra.mxu3 %v1375_v30 }
  0x52   :  { %826 = vmatpush.bf16.msra.mxu0 %v1350_v15 }
  0x53   :  { %839 = vmatpush.bf16.msra.mxu1 %v1358_v16  ;;  %852 = vmatpush.bf16.msra.mxu2 %v1366_v28 }
  0x55   :  { %865 = vmatpush.bf16.msra.mxu3 %v1374_v32 }
  0x56   :  { %827 = vmatpush.bf16.msra.mxu0 %v1349_v19 }
  0x57   :  { %840 = vmatpush.bf16.msra.mxu1 %v1357_v17  ;;  %853 = vmatpush.bf16.msra.mxu2 %v1365_v31 }
  0x59   :  { %866 = vmatpush.bf16.msra.mxu3 %v1373_v34 }
  0x5a   :  { %828 = vmatpush.bf16.msra.mxu0 %v1348_v18  ;;  %v1382_v18 = vld [vmem:[%s1608_s5] ss:$0 sm:$0xff] }
  0x5b   :  { %841 = vmatpush.bf16.msra.mxu1 %v1356_v20  ;;  %854 = vmatpush.bf16.msra.mxu2 %v1364_v33 }
  0x5d   :  { %867 = vmatpush.bf16.msra.mxu3 %v1372_v36 }
  0x5e   :  { %829 = vmatpush.bf16.msra.mxu0 %v1347_v21 }
  0x5f   :  { %842 = vmatpush.bf16.msra.mxu1 %v1355_v22  ;;  %855 = vmatpush.bf16.msra.mxu2 %v1363_v35 }
  0x61   :  { %868 = vmatpush.bf16.msra.mxu3 %v1371_v38 }
  0x62   :  { %830 = vmatpush.bf16.msra.mxu0 %v1346_v23 }
  0x63   :  { %843 = vmatpush.bf16.msra.mxu1 %v1354_v25  ;;  %856 = vmatpush.bf16.msra.mxu2 %v1362_v37 }
  0x65   :  { %869 = vmatpush.bf16.msra.mxu3 %v1370_v41 }
  0x66   :  { %831 = vmatpush.bf16.msra.mxu0 %v1345_v27 }
  0x67   :  { %844 = vmatpush.bf16.msra.mxu1 %v1353_v29  ;;  %857 = vmatpush.bf16.msra.mxu2 %v1361_v40 }
  0x69   :  { %870 = vmatpush.bf16.msra.mxu3 %v1369_v44 }
  0xae   :  { %v461_v43 = vpop.f32.mrf.mxu0 }
  0xaf   :  { %v462_v45 = vadd.f32 %v461_v43, %v117_v42  ;;  %v474_v46 = vpop.f32.mrf.mxu1 }
  0xb1   :  { %v475_v48 = vadd.f32 %v474_v46, %v462_v45 }
  0xb3   :  { %v487_v49 = vpop.f32.mrf.mxu2  ;;  %v556_v50 = vmax.f32 %v475_v48, 0.0 }
  0xb4   :  { %v488_v51 = vadd.f32 %v487_v49, %v118_v47  ;;  %v500_v52 = vpop.f32.mrf.mxu3 }
  0xb5   :  { %v560_v53 = vpack.c.bf16 %v556_v50, %v556_v50 }
  0xb6   :  { %v501_v54 = vadd.f32 %v500_v52, %v488_v51  ;;  %v463_v55 = vpop.f32.mrf.mxu0 }
  0xb7   :  { %832 = vmatmul.bf16.vlgmr.msra.gmra.mxu0 %v560_v53  ;;  %v476_v57 = vpop.f32.mrf.mxu1 }
  0xb8   :  { %v557_v56 = vmax.f32 %v501_v54, 0.0 }
  0xba   :  { %v561_v58 = vpack.c.bf16 %v557_v56, %v557_v56 }
  0xbb   :  { %v489_v59 = vpop.f32.mrf.mxu2 }
  0xbc   :  { %845 = vmatmul.bf16.vlgmr.msra.gmra.mxu1 %v561_v58  ;;  %v502_v60 = vpop.f32.mrf.mxu3 }
  0xc6   :  { %v513_v62 = vpop.f32.mrf.mxu0 }
  0xc7   :  { %v514_v63 = vadd.f32 %v513_v62, %v119_v61  ;;  %v526_v0 = vpop.f32.mrf.mxu1 }
  0xc9   :  { %v527_v1 = vadd.f32 %v526_v0, %v514_v63 }
  0xcb   :  { %v558_v2 = vmax.f32 %v527_v1, 0.0 }
  0xcd   :  { %v562_v4 = vpack.c.bf16 %v558_v2, %v558_v2 }
  0xce   :  { %v515_v8 = vpop.f32.mrf.mxu0 }
  0xcf   :  { %v539_v5 = vpop.f32.mrf.mxu2  ;;  %v552_v6 = vpop.f32.mrf.mxu3  ;;  %858 = vmatmul.bf16.vlgmr.msra.gmra.mxu2 %v562_v4 }
  0xd0   :  { %v540_v7 = vadd.f32 %v539_v5, %v120_v3  ;;  %v528_v9 = vpop.f32.mrf.mxu1 }
  0xd2   :  { %v553_v10 = vadd.f32 %v552_v6, %v540_v7 }
  0xd4   :  { %v559_v11 = vmax.f32 %v553_v10, 0.0 }
  0xd6   :  { %v563_v12 = vpack.c.bf16 %v559_v11, %v559_v11 }
  0xd7   :  { %v541_v13 = vpop.f32.mrf.mxu2  ;;  %v554_v14 = vpop.f32.mrf.mxu3 }
  0xd8   :  { %871 = vmatmul.bf16.vlgmr.msra.gmra.mxu3 %v563_v12 }
 0x134   :  { %v833_v15 = vpop.f32.mrf.mxu0 }
 0x135   :  { %v834_v21 = vadd.f32 %v1382_v18, %v833_v15 }
 0x139   :  { %v846_v16 = vpop.f32.mrf.mxu1 }
 0x13a   :  { %v847_v22 = vadd.f32 %v846_v16, %v834_v21 }
 0x13c   :  { %v835_v19 = vpop.f32.mrf.mxu0 }
 0x141   :  { %v848_v17 = vpop.f32.mrf.mxu1 }
 0x152   :  { %v859_v20 = vpop.f32.mrf.mxu2 }
 0x153   :  { %v860_v23 = vadd.f32 %v859_v20, %v847_v22 }
 0x15a   :  { %v861_v25 = vpop.f32.mrf.mxu2 }
 0x15b   :  { %v872_v24 = vpop.f32.mrf.mxu3 }
 0x15c   :  { %v873_v26 = vadd.f32 %v872_v24, %v860_v23 }
 0x15e   :  { %v876_v27 = vmax.f32 %v873_v26, 0.0 }
 0x160   :  { %v877_v28 = vpack.c.bf16 %v876_v27, %v876_v27 }
 0x162   :  { %879 = vst.msk [vmem:[#allocation6] sm:$0xf] %vm878_vm2, %v877_v28 }
 0x163   :  { %v874_v29 = vpop.f32.mrf.mxu3  ;;  %890 = dma.vmem_to_hbm [thread:$0]  %s886_s18, 64, %s888_s21, [#allocation5]  }
 0x164   :  { %1433 = dma.done.wait [#allocation5], 64  }
 0x165   :  { %1434 = vsyncadd [#allocation5], 4294967232 }
 0x166   :  { %895 = vsyncpa [#allocation4], 1 }
 0x167   :  { %896 = vsyncpa [#allocation5], 1 }

</bundles_post_ra>
